<compile_context>
chip_gen: v7x
topology: tpu7x:2x2x1
jax: 0.10.0
libtpu: 0.0.40
codegen_flags: <defaults>
</compile_context>

<pallas_src>
import jax
import jax.numpy as jnp
from jax.experimental import pallas as pl
from jax.experimental.pallas import tpu as pltpu

_ROW = 16  # bf16 sublane packing: batch padding / tiles aligned to 16 rows


def _round_up(x, m):
    return (x + m - 1) // m * m


def _tensorcores_per_device():
    """2 for dual-TensorCore chips (v7x, v4/v5p megacore), else 1."""
    try:
        kind = jax.devices()[0].device_kind.lower()
    except Exception:
        return 1
    if any(tag in kind for tag in ("v7", "7x", "v4", "v5p")):
        return 2
    return 1


def bc_stack_kernel(x_ref,
                    w1_ref, b1_ref,
                    w2_ref, b2_ref,
                    w3_ref, b3_ref,
                    w4_ref, b4_ref,
                    w5_ref, b5_ref,
                    o_ref):
    """One (tm, in_dim) bf16 batch tile through the 5-layer MLP."""

    def layer(h_bf16, w_ref, b_ref, relu):
        # bf16 MXU operands, f32 accumulation; bias add + ReLU in f32.
        acc = jnp.dot(h_bf16, w_ref[...], preferred_element_type=jnp.float32)
        acc = acc + b_ref[...]
        if relu:
            acc = jnp.maximum(acc, 0.0)
        return acc

    h = layer(x_ref[...], w1_ref, b1_ref, True)
    h = layer(h.astype(jnp.bfloat16), w2_ref, b2_ref, True)    # Dropout(0.4) -> id (eval)
    h = layer(h.astype(jnp.bfloat16), w3_ref, b3_ref, True)    # Dropout(0.4) -> id (eval)
    h = layer(h.astype(jnp.bfloat16), w4_ref, b4_ref, True)    # Dropout(0.2) -> id (eval)
    out = layer(h.astype(jnp.bfloat16), w5_ref, b5_ref, False)  # output head
    o_ref[...] = out.astype(o_ref.dtype)                        # lane-dense bf16 store


def prepare_params(params):
    """One-time parameter prep: bf16 weights, (1,n) f32 biases, lane-dense pads."""
    (w1, b1), (w2, b2), (w3, b3), (w4, b4), (w5, b5) = params
    in_dim = w1.shape[0]
    action_dim = w5.shape[1]
    h4 = w4.shape[1]

    # Lane-dense layer-4 width and output head (zero padding keeps math exact).
    h4_pad = _round_up(h4, 128)
    out_pad = _round_up(action_dim, 128)
    w4p = jnp.pad(w4, ((0, 0), (0, h4_pad - h4)))
    b4p = jnp.pad(b4, ((0, h4_pad - h4),))
    w5p = jnp.pad(w5, ((0, h4_pad - h4), (0, out_pad - action_dim)))
    b5p = jnp.pad(b5, ((0, out_pad - action_dim),))

    flat = []
    for w, b in zip((w1, w2, w3, w4p, w5p), (b1, b2, b3, b4p, b5p)):
        flat.append(w.astype(jnp.bfloat16))                  # bf16: 2x MXU rate, half HBM/VMEM
        flat.append(b.reshape(1, -1).astype(jnp.float32))    # f32, 2-D so it tiles cleanly
    return {"flat": tuple(flat), "in_dim": in_dim,
            "action_dim": action_dim, "out_pad": out_pad}


def bc_stack_forward(state, prepped, *, tm=1024):
    """state: (B, state_dim + stage_dim) f32. Returns (B, action_dim) f32."""
    flat = prepped["flat"]
    action_dim = prepped["action_dim"]
    out_pad = prepped["out_pad"]
    B, in_dim = state.shape
    assert in_dim == prepped["in_dim"]

    # ---- choose the batch tile ---------------------------------------------
    B_al = _round_up(B, _ROW)
    n_cores = _tensorcores_per_device()
    tm_eff = min(_round_up(tm, _ROW), B_al)          # never inflate tiny batches
    if n_cores >= 2 and B_al // tm_eff < n_cores and B_al >= n_cores * _ROW:
        # Dual-TC chips only: keep >= n_cores parallel grid steps.
        tm_eff = _round_up(pl.cdiv(B_al, n_cores), _ROW)
    B_pad = _round_up(B_al, tm_eff)
    grid = (B_pad // tm_eff,)

    # ---- wrapper-side layout plumbing (no in-kernel reshapes / casts) -------
    x = state.astype(jnp.bfloat16)
    if B_pad != B:
        x = jnp.pad(x, ((0, B_pad - B), (0, 0)))

    in_specs = [pl.BlockSpec((tm_eff, in_dim), lambda i: (i, 0))]
    for arr in flat:
        # Full-array blocks, constant index_map -> resident across the grid.
        in_specs.append(pl.BlockSpec(arr.shape, lambda i: (0, 0)))
    out_specs = pl.BlockSpec((tm_eff, out_pad), lambda i: (i, 0))

    # Advisory cost hint for XLA's scheduler.
    h1 = flat[0].shape[1]
    h2 = flat[2].shape[1]
    h3 = flat[4].shape[1]
    h4p = flat[6].shape[1]
    flops = 2 * B_pad * (in_dim * h1 + h1 * h2 + h2 * h3 + h3 * h4p + h4p * out_pad)
    bytes_accessed = (
        int(x.size) * 2
        + sum(int(a.size) * a.dtype.itemsize for a in flat)
        + B_pad * out_pad * 2
    )
    cost = pl.CostEstimate(flops=flops, transcendentals=0,
                           bytes_accessed=bytes_accessed)

    out = pl.pallas_call(
        bc_stack_kernel,
        out_shape=jax.ShapeDtypeStruct((B_pad, out_pad), jnp.bfloat16),
        grid_spec=pltpu.PrefetchScalarGridSpec(
            num_scalar_prefetch=0,
            grid=grid,
            in_specs=in_specs,
            out_specs=out_specs,
        ),
        # Per-step buffers at tm=1024: x (1024,12) bf16, out (1024,128) bf16,
        # ~0.37 MiB bf16 weights (resident) and a few (1024,256) f32/bf16
        # intermediates -> well under the 16/32/32 MiB scoped-VMEM defaults,
        # so no vmem_limit_bytes is needed.
        compiler_params=pltpu.CompilerParams(
            dimension_semantics=("parallel",)),
        cost_estimate=cost,
    )(x, *flat)

    return out[:B, :action_dim].astype(jnp.float32)


def init_linear(key, fan_in, fan_out, dtype=jnp.float32):
    """Deterministic init matching nn.Linear's default U(-1/sqrt(fan_in), ...)."""
    kw, kb = jax.random.split(key)
    bound = 1.0 / jnp.sqrt(jnp.array(fan_in, dtype))
    w = jax.random.uniform(kw, (fan_in, fan_out), dtype, -bound, bound)
    b = jax.random.uniform(kb, (fan_out,), dtype, -bound, bound)
    return w, b


def reference_forward_f32(state, params):
    x = state
    for idx, (w, b) in enumerate(params):
        x = x @ w + b
        if idx < len(params) - 1:
            x = jnp.maximum(x, 0.0)
    return x


def reference_forward_bf16(state, params):
    """Mirrors the kernel's numerics: bf16 MXU operands, f32 accumulation."""
    h = state.astype(jnp.bfloat16)
    acc = None
    for idx, (w, b) in enumerate(params):
        acc = jnp.dot(h, w.astype(jnp.bfloat16),
                      preferred_element_type=jnp.float32) + b
        if idx < len(params) - 1:
            acc = jnp.maximum(acc, 0.0)
        h = acc.astype(jnp.bfloat16)
    return acc


if __name__ == "__main__":
    # Small, forward-consistent shapes.
    state_dim = 8
    stage_dim = 4
    action_dim = 6
    batch = 16

    in_dim = state_dim + stage_dim
    dims = [in_dim, 256, 256, 256, state_dim * 4, action_dim]

    key = jax.random.PRNGKey(0)
    keys = jax.random.split(key, 6)
    params = [init_linear(keys[i], dims[i], dims[i + 1]) for i in range(5)]
    prepped = prepare_params(params)   # one-time bf16 cast + lane-dense padding

    x = jax.random.normal(keys[5], (batch, in_dim), jnp.float32)

    out = jax.block_until_ready(bc_stack_forward(x, prepped))
    assert out.shape == (batch, action_dim)

    ref_bf16 = reference_forward_bf16(x, params)   # same numerics as the kernel
    ref_f32 = reference_forward_f32(x, params)     # pure-f32 semantic check
    # Tolerances allow for the kernel's bf16 output store (<= ~0.4% rounding).
    assert jnp.allclose(out, ref_bf16, atol=1e-2, rtol=1e-2), "mismatch vs bf16 reference"
    assert jnp.allclose(out, ref_f32, atol=6e-2, rtol=6e-2), "mismatch vs f32 reference"

    print("KERNEL_OK")
</pallas_src>

<mosaic_0001>
module attributes {stable_mosaic.version = 11 : i64} {
  func.func @bc_stack_kernel(%arg0: i32, %arg1: memref<16x12xbf16, #tpu.memory_space<vmem>>, %arg2: memref<12x256xbf16, #tpu.memory_space<vmem>>, %arg3: memref<1x256xf32, #tpu.memory_space<vmem>>, %arg4: memref<256x256xbf16, #tpu.memory_space<vmem>>, %arg5: memref<1x256xf32, #tpu.memory_space<vmem>>, %arg6: memref<256x256xbf16, #tpu.memory_space<vmem>>, %arg7: memref<1x256xf32, #tpu.memory_space<vmem>>, %arg8: memref<256x128xbf16, #tpu.memory_space<vmem>>, %arg9: memref<1x128xf32, #tpu.memory_space<vmem>>, %arg10: memref<128x128xbf16, #tpu.memory_space<vmem>>, %arg11: memref<1x128xf32, #tpu.memory_space<vmem>>, %arg12: memref<16x128xbf16, #tpu.memory_space<vmem>>) attributes {dimension_semantics = [#tpu.dimension_semantics<parallel>], iteration_bounds = array<i64: 1>, scalar_prefetch = 0 : i64, scratch_operands = 0 : i64, tpu.core_type = #tpu.core_type<tc>, window_params = [{transform_indices = @transform_0, window_bounds = array<i64: 16, 12>}, {pipeline_mode = #tpu.pipeline_mode<synchronous>, transform_indices = @transform_1, window_bounds = array<i64: 12, 256>}, {pipeline_mode = #tpu.pipeline_mode<synchronous>, transform_indices = @transform_2, window_bounds = array<i64: 1, 256>}, {pipeline_mode = #tpu.pipeline_mode<synchronous>, transform_indices = @transform_3, window_bounds = array<i64: 256, 256>}, {pipeline_mode = #tpu.pipeline_mode<synchronous>, transform_indices = @transform_4, window_bounds = array<i64: 1, 256>}, {pipeline_mode = #tpu.pipeline_mode<synchronous>, transform_indices = @transform_5, window_bounds = array<i64: 256, 256>}, {pipeline_mode = #tpu.pipeline_mode<synchronous>, transform_indices = @transform_6, window_bounds = array<i64: 1, 256>}, {pipeline_mode = #tpu.pipeline_mode<synchronous>, transform_indices = @transform_7, window_bounds = array<i64: 256, 128>}, {pipeline_mode = #tpu.pipeline_mode<synchronous>, transform_indices = @transform_8, window_bounds = array<i64: 1, 128>}, {pipeline_mode = #tpu.pipeline_mode<synchronous>, transform_indices = @transform_9, window_bounds = array<i64: 128, 128>}, {pipeline_mode = #tpu.pipeline_mode<synchronous>, transform_indices = @transform_10, window_bounds = array<i64: 1, 128>}, {transform_indices = @transform_11, window_bounds = array<i64: 16, 128>}]} {
    %c0 = arith.constant 0 : index
    %c0_0 = arith.constant 0 : index
    %0 = vector.load %arg1[%c0, %c0_0] : memref<16x12xbf16, #tpu.memory_space<vmem>>, vector<16x12xbf16>
    %c0_1 = arith.constant 0 : index
    %c0_2 = arith.constant 0 : index
    %1 = vector.load %arg2[%c0_1, %c0_2] : memref<12x256xbf16, #tpu.memory_space<vmem>>, vector<12x256xbf16>
    %cst = arith.constant dense<0.000000e+00> : vector<16x256xf32>
    %2 = tpu.matmul %0, %1, %cst {dimension_numbers = #tpu.dot_dimension_numbers<[1], [0], [0], [1], [0, 0, 1, 1], [], []>} : vector<16x12xbf16>, vector<12x256xbf16>, vector<16x256xf32> -> vector<16x256xf32>
    %c0_3 = arith.constant 0 : index
    %c0_4 = arith.constant 0 : index
    %3 = vector.load %arg3[%c0_3, %c0_4] : memref<1x256xf32, #tpu.memory_space<vmem>>, vector<1x256xf32>
    %4 = vector.broadcast %3 : vector<1x256xf32> to vector<16x256xf32>
    %5 = arith.addf %2, %4 : vector<16x256xf32>
    %cst_5 = arith.constant 0.000000e+00 : f32
    %6 = vector.broadcast %cst_5 : f32 to vector<16x256xf32>
    %7 = arith.maximumf %5, %6 : vector<16x256xf32>
    %8 = arith.truncf %7 : vector<16x256xf32> to vector<16x256xbf16>
    %c0_6 = arith.constant 0 : index
    %c0_7 = arith.constant 0 : index
    %9 = vector.load %arg4[%c0_6, %c0_7] : memref<256x256xbf16, #tpu.memory_space<vmem>>, vector<256x256xbf16>
    %cst_8 = arith.constant dense<0.000000e+00> : vector<16x256xf32>
    %10 = tpu.matmul %8, %9, %cst_8 {dimension_numbers = #tpu.dot_dimension_numbers<[1], [0], [0], [1], [0, 0, 1, 1], [], []>} : vector<16x256xbf16>, vector<256x256xbf16>, vector<16x256xf32> -> vector<16x256xf32>
    %c0_9 = arith.constant 0 : index
    %c0_10 = arith.constant 0 : index
    %11 = vector.load %arg5[%c0_9, %c0_10] : memref<1x256xf32, #tpu.memory_space<vmem>>, vector<1x256xf32>
    %12 = vector.broadcast %11 : vector<1x256xf32> to vector<16x256xf32>
    %13 = arith.addf %10, %12 : vector<16x256xf32>
    %cst_11 = arith.constant 0.000000e+00 : f32
    %14 = vector.broadcast %cst_11 : f32 to vector<16x256xf32>
    %15 = arith.maximumf %13, %14 : vector<16x256xf32>
    %16 = arith.truncf %15 : vector<16x256xf32> to vector<16x256xbf16>
    %c0_12 = arith.constant 0 : index
    %c0_13 = arith.constant 0 : index
    %17 = vector.load %arg6[%c0_12, %c0_13] : memref<256x256xbf16, #tpu.memory_space<vmem>>, vector<256x256xbf16>
    %cst_14 = arith.constant dense<0.000000e+00> : vector<16x256xf32>
    %18 = tpu.matmul %16, %17, %cst_14 {dimension_numbers = #tpu.dot_dimension_numbers<[1], [0], [0], [1], [0, 0, 1, 1], [], []>} : vector<16x256xbf16>, vector<256x256xbf16>, vector<16x256xf32> -> vector<16x256xf32>
    %c0_15 = arith.constant 0 : index
    %c0_16 = arith.constant 0 : index
    %19 = vector.load %arg7[%c0_15, %c0_16] : memref<1x256xf32, #tpu.memory_space<vmem>>, vector<1x256xf32>
    %20 = vector.broadcast %19 : vector<1x256xf32> to vector<16x256xf32>
    %21 = arith.addf %18, %20 : vector<16x256xf32>
    %cst_17 = arith.constant 0.000000e+00 : f32
    %22 = vector.broadcast %cst_17 : f32 to vector<16x256xf32>
    %23 = arith.maximumf %21, %22 : vector<16x256xf32>
    %24 = arith.truncf %23 : vector<16x256xf32> to vector<16x256xbf16>
    %c0_18 = arith.constant 0 : index
    %c0_19 = arith.constant 0 : index
    %25 = vector.load %arg8[%c0_18, %c0_19] : memref<256x128xbf16, #tpu.memory_space<vmem>>, vector<256x128xbf16>
    %cst_20 = arith.constant dense<0.000000e+00> : vector<16x128xf32>
    %26 = tpu.matmul %24, %25, %cst_20 {dimension_numbers = #tpu.dot_dimension_numbers<[1], [0], [0], [1], [0, 0, 1, 1], [], []>} : vector<16x256xbf16>, vector<256x128xbf16>, vector<16x128xf32> -> vector<16x128xf32>
    %c0_21 = arith.constant 0 : index
    %c0_22 = arith.constant 0 : index
    %27 = vector.load %arg9[%c0_21, %c0_22] : memref<1x128xf32, #tpu.memory_space<vmem>>, vector<1x128xf32>
    %28 = vector.broadcast %27 : vector<1x128xf32> to vector<16x128xf32>
    %29 = arith.addf %26, %28 : vector<16x128xf32>
    %cst_23 = arith.constant 0.000000e+00 : f32
    %30 = vector.broadcast %cst_23 : f32 to vector<16x128xf32>
    %31 = arith.maximumf %29, %30 : vector<16x128xf32>
    %32 = arith.truncf %31 : vector<16x128xf32> to vector<16x128xbf16>
    %c0_24 = arith.constant 0 : index
    %c0_25 = arith.constant 0 : index
    %33 = vector.load %arg10[%c0_24, %c0_25] : memref<128x128xbf16, #tpu.memory_space<vmem>>, vector<128x128xbf16>
    %cst_26 = arith.constant dense<0.000000e+00> : vector<16x128xf32>
    %34 = tpu.matmul %32, %33, %cst_26 {dimension_numbers = #tpu.dot_dimension_numbers<[1], [0], [0], [1], [0, 0, 1, 1], [], []>} : vector<16x128xbf16>, vector<128x128xbf16>, vector<16x128xf32> -> vector<16x128xf32>
    %c0_27 = arith.constant 0 : index
    %c0_28 = arith.constant 0 : index
    %35 = vector.load %arg11[%c0_27, %c0_28] : memref<1x128xf32, #tpu.memory_space<vmem>>, vector<1x128xf32>
    %36 = vector.broadcast %35 : vector<1x128xf32> to vector<16x128xf32>
    %37 = arith.addf %34, %36 : vector<16x128xf32>
    %38 = arith.truncf %37 : vector<16x128xf32> to vector<16x128xbf16>
    %c0_29 = arith.constant 0 : index
    %c0_30 = arith.constant 0 : index
    %39 = vector.load %arg12[%c0_29, %c0_30] : memref<16x128xbf16, #tpu.memory_space<vmem>>, vector<16x128xbf16>
    tpu.vector_store %arg12[%c0_29, %c0_30], %38 {strides = array<i32>} : memref<16x128xbf16, #tpu.memory_space<vmem>>, vector<16x128xbf16>,
    return
  }
  func.func @transform_0(%arg0: i32) -> (i32, i32) {
    %c0_i32 = arith.constant 0 : i32
    %c0_i32_0 = arith.constant 0 : i32
    return %arg0, %c0_i32 : i32, i32
  }
  func.func @transform_1(%arg0: i32) -> (i32, i32) {
    %c0_i32 = arith.constant 0 : i32
    %c0_i32_0 = arith.constant 0 : i32
    %c0_i32_1 = arith.constant 0 : i32
    return %c0_i32, %c0_i32_0 : i32, i32
  }
  func.func @transform_2(%arg0: i32) -> (i32, i32) {
    %c0_i32 = arith.constant 0 : i32
    %c0_i32_0 = arith.constant 0 : i32
    %c0_i32_1 = arith.constant 0 : i32
    return %c0_i32, %c0_i32_0 : i32, i32
  }
  func.func @transform_3(%arg0: i32) -> (i32, i32) {
    %c0_i32 = arith.constant 0 : i32
    %c0_i32_0 = arith.constant 0 : i32
    %c0_i32_1 = arith.constant 0 : i32
    return %c0_i32, %c0_i32_0 : i32, i32
  }
  func.func @transform_4(%arg0: i32) -> (i32, i32) {
    %c0_i32 = arith.constant 0 : i32
    %c0_i32_0 = arith.constant 0 : i32
    %c0_i32_1 = arith.constant 0 : i32
    return %c0_i32, %c0_i32_0 : i32, i32
  }
  func.func @transform_5(%arg0: i32) -> (i32, i32) {
    %c0_i32 = arith.constant 0 : i32
    %c0_i32_0 = arith.constant 0 : i32
    %c0_i32_1 = arith.constant 0 : i32
    return %c0_i32, %c0_i32_0 : i32, i32
  }
  func.func @transform_6(%arg0: i32) -> (i32, i32) {
    %c0_i32 = arith.constant 0 : i32
    %c0_i32_0 = arith.constant 0 : i32
    %c0_i32_1 = arith.constant 0 : i32
    return %c0_i32, %c0_i32_0 : i32, i32
  }
  func.func @transform_7(%arg0: i32) -> (i32, i32) {
    %c0_i32 = arith.constant 0 : i32
    %c0_i32_0 = arith.constant 0 : i32
    %c0_i32_1 = arith.constant 0 : i32
    return %c0_i32, %c0_i32_0 : i32, i32
  }
  func.func @transform_8(%arg0: i32) -> (i32, i32) {
    %c0_i32 = arith.constant 0 : i32
    %c0_i32_0 = arith.constant 0 : i32
    %c0_i32_1 = arith.constant 0 : i32
    return %c0_i32, %c0_i32_0 : i32, i32
  }
  func.func @transform_9(%arg0: i32) -> (i32, i32) {
    %c0_i32 = arith.constant 0 : i32
    %c0_i32_0 = arith.constant 0 : i32
    %c0_i32_1 = arith.constant 0 : i32
    return %c0_i32, %c0_i32_0 : i32, i32
  }
  func.func @transform_10(%arg0: i32) -> (i32, i32) {
    %c0_i32 = arith.constant 0 : i32
    %c0_i32_0 = arith.constant 0 : i32
    %c0_i32_1 = arith.constant 0 : i32
    return %c0_i32, %c0_i32_0 : i32, i32
  }
  func.func @transform_11(%arg0: i32) -> (i32, i32) {
    %c0_i32 = arith.constant 0 : i32
    %c0_i32_0 = arith.constant 0 : i32
    return %arg0, %c0_i32 : i32, i32
  }
}

</mosaic_0001>

<bundles_post_ra>
// kernel: tpu_custom_call.1
= control target key start
LH: loop header
LB: loop body
LE: loop exit
PB: predicated region body
PF: predicated region fallthrough
CT: control target
= control target key end

     0   :  { %16 = vsyncpa [#allocation3], 0  ;;  %s1699_s0 = inlined_call_operand.hbm [shape: bf16[16,12], index: 0, kind: input, shape index: {}]   ;;  %s1700_s1 = inlined_call_operand.hbm [shape: bf16[12,256], index: 1, kind: input, shape index: {}]   ;;  %s1701_s2 = inlined_call_operand.vmem [shape: f32[1,256], index: 2, kind: input, shape index: {}]   ;;  %s1702_s3 = inlined_call_operand.hbm [shape: bf16[256,256], index: 3, kind: input, shape index: {}]   ;;  %s1703_s4 = inlined_call_operand.vmem [shape: f32[1,256], index: 4, kind: input, shape index: {}]   ;;  %s1704_s5 = inlined_call_operand.hbm [shape: bf16[256,256], index: 5, kind: input, shape index: {}]   ;;  %s1705_s6 = inlined_call_operand.vmem [shape: f32[1,256], index: 6, kind: input, shape index: {}]   ;;  %s1706_s7 = inlined_call_operand.hbm [shape: bf16[256,128], index: 7, kind: input, shape index: {}]   ;;  %s1707_s8 = inlined_call_operand.vmem [shape: f32[1,128], index: 8, kind: input, shape index: {}]   ;;  %s1708_s9 = inlined_call_operand.hbm [shape: bf16[128,128], index: 9, kind: input, shape index: {}]   ;;  %s1709_s10 = inlined_call_operand.vmem [shape: f32[1,128], index: 10, kind: input, shape index: {}]   ;;  %s1710_s11 = inlined_call_operand.hbm [shape: bf16[16,128], index: 11, kind: output, shape index: {}]  }
   0x1   :  { %17 = vsyncpa [#allocation6], 0 }
   0x2   :  { %18 = vsyncpa [#allocation9], 0 }
   0x3   :  { %19 = vsyncpa [#allocation12], 0 }
   0x4   :  { %20 = vsyncpa [#allocation4], 0  ;;  %s1495_s17 = smov [#allocation5]   ;;  %s1331_s21 = scalar_lea.hbm %s1700_s1, 256 }
   0x5   :  { %s38_s18 = sshll.u32 %s1495_s17, 4  ;;  %p1332_p0 = scmp.ne.s32.totalorder %s1700_s1, %s1331_s21  ;;  %s39_s18 = int_to_ptr.vmem [resolvable:$true] %s38_s18 }
   0x6   :  { %p1335_p1 = scmp.lt.u32.totalorder %s1331_s21, %s1700_s1 }
   0x8   :  { %p1337_p2 = pnand %p1335_p1, %p1332_p0 }
   0xa   :  { %1340 = shalt.err (!%p1337_p2)
}
   0xb   :  { %s1341_s26 = scalar_lea.vmem %s39_s18, 256  ;;  %p1346_p4 = scmp.lt.s32.totalorder %s39_s18, %s39_s18 }
   0xc   :  { %p1342_p3 = scmp.ne.s32.totalorder %s39_s18, %s1341_s26  ;;  %p1347_p5 = scmp.lt.s32.totalorder %s1341_s26, %s1341_s26 }
   0xe   :  { %p1348_p6 = por %p1347_p5, %p1346_p4 }
  0x10   :  { %p1349_p7 = pnand %p1348_p6, %p1342_p3 }
  0x12   :  { %1352 = shalt.err (!%p1349_p7)
}
  0x13   :  { %s1496_s27 = smov 128   ;;  %s1497_s28 = smov 8  }
  0x14   :  { %44 = dma.hbm_to_vmem [thread:$0]  %s1700_s1, 256, %s39_s18, [#allocation6], %s1496_s27, %s1496_s27, %s1497_s28  }
  0x15   :  { %s1498_s12 = smov [#allocation8]   ;;  %s1499_s14 = smov [#allocation2]  }
  0x16   :  { %s66_s13 = sshll.u32 %s1498_s12, 4  ;;  %s26_s15 = sshll.u32 %s1499_s14, 4  ;;  %s67_s13 = int_to_ptr.vmem [resolvable:$true] %s66_s13  ;;  %s27_s15 = int_to_ptr.vmem [resolvable:$true] %s26_s15 }
  0x17   :  { %s1353_s19 = scalar_lea.hbm %s1704_s5, 4096 }
  0x18   :  { %p1354_p8 = scmp.ne.s32.totalorder %s1704_s5, %s1353_s19  ;;  %p1357_p9 = scmp.lt.u32.totalorder %s1353_s19, %s1704_s5 }
  0x1a   :  { %p1359_p10 = pnand %p1357_p9, %p1354_p8 }
  0x1c   :  { %1362 = shalt.err (!%p1359_p10)
}
  0x1d   :  { %s1363_s1 = scalar_lea.vmem %s67_s13, 4096  ;;  %p1368_p12 = scmp.lt.s32.totalorder %s67_s13, %s67_s13 }
  0x1e   :  { %p1364_p11 = scmp.ne.s32.totalorder %s67_s13, %s1363_s1  ;;  %p1369_p13 = scmp.lt.s32.totalorder %s1363_s1, %s1363_s1 }
  0x20   :  { %p1370_p0 = por %p1369_p13, %p1368_p12 }
  0x22   :  { %p1371_p1 = pnand %p1370_p0, %p1364_p11 }
  0x24   :  { %1374 = shalt.err (!%p1371_p1)
}
  0x25   :  { %72 = dma.hbm_to_vmem [thread:$0]  %s1704_s5, 4096, %s67_s13, [#allocation9], %s1496_s27, %s1496_s27, %s1497_s28  }
  0x26   :  { %s1375_s29 = scalar_lea.hbm %s1699_s0, 128 }
  0x27   :  { %p1376_p2 = scmp.ne.s32.totalorder %s1699_s0, %s1375_s29  ;;  %p1379_p3 = scmp.lt.u32.totalorder %s1375_s29, %s1699_s0 }
  0x29   :  { %p1381_p4 = pnand %p1379_p3, %p1376_p2 }
  0x2b   :  { %1384 = shalt.err (!%p1381_p4)
}
  0x2c   :  { %s1385_s17 = scalar_lea.vmem %s27_s15, 128  ;;  %p1390_p6 = scmp.lt.s32.totalorder %s27_s15, %s27_s15 }
  0x2d   :  { %p1386_p5 = scmp.ne.s32.totalorder %s27_s15, %s1385_s17  ;;  %p1391_p7 = scmp.lt.s32.totalorder %s1385_s17, %s1385_s17 }
  0x2f   :  { %p1392_p8 = por %p1391_p7, %p1390_p6 }
  0x31   :  { %p1393_p9 = pnand %p1392_p8, %p1386_p5 }
  0x33   :  { %1396 = shalt.err (!%p1393_p9)
}
  0x34   :  { %s1500_s5 = smov 64   ;;  %s1501_s13 = smov 4  }
  0x35   :  { %32 = dma.hbm_to_vmem [thread:$0]  %s1699_s0, 128, %s27_s15, [#allocation3], %s1500_s5, %s1500_s5, %s1501_s13  }
  0x36   :  { %s1502_s21 = smov [#allocation7]   ;;  %s1503_s23 = smov [#allocation10]  }
  0x37   :  { %s52_s22 = sshll.u32 %s1502_s21, 4  ;;  %s80_s1 = sshll.u32 %s1503_s23, 4  ;;  %s53_s22 = int_to_ptr.vmem [resolvable:$true] %s52_s22  ;;  %s81_s1 = int_to_ptr.vmem [resolvable:$true] %s80_s1 }
  0x38   :  { %s1397_s25 = scalar_lea.hbm %s1702_s3, 4096 }
  0x39   :  { %p1398_p10 = scmp.ne.s32.totalorder %s1702_s3, %s1397_s25  ;;  %p1401_p11 = scmp.lt.u32.totalorder %s1397_s25, %s1702_s3 }
  0x3b   :  { %p1403_p12 = pnand %p1401_p11, %p1398_p10 }
  0x3d   :  { %1406 = shalt.err (!%p1403_p12)
}
  0x3e   :  { %s1407_s0 = scalar_lea.vmem %s53_s22, 4096  ;;  %p1412_p0 = scmp.lt.s32.totalorder %s53_s22, %s53_s22 }
  0x3f   :  { %p1408_p13 = scmp.ne.s32.totalorder %s53_s22, %s1407_s0  ;;  %p1413_p1 = scmp.lt.s32.totalorder %s1407_s0, %s1407_s0 }
  0x41   :  { %p1414_p2 = por %p1413_p1, %p1412_p0 }
  0x43   :  { %p1415_p3 = pnand %p1414_p2, %p1408_p13 }
  0x45   :  { %1418 = shalt.err (!%p1415_p3)
}
  0x46   :  { %58 = dma.hbm_to_vmem [thread:$0]  %s1702_s3, 4096, %s53_s22, [#allocation6], %s1496_s27, %s1496_s27, %s1497_s28  }
  0x47   :  { %s1419_s19 = scalar_lea.hbm %s1706_s7, 2048 }
  0x48   :  { %p1420_p4 = scmp.ne.s32.totalorder %s1706_s7, %s1419_s19  ;;  %p1423_p5 = scmp.lt.u32.totalorder %s1419_s19, %s1706_s7 }
  0x4a   :  { %p1425_p6 = pnand %p1423_p5, %p1420_p4 }
  0x4c   :  { %1428 = shalt.err (!%p1425_p6)
}
  0x4d   :  { %s1429_s24 = scalar_lea.vmem %s81_s1, 2048  ;;  %p1434_p8 = scmp.lt.s32.totalorder %s81_s1, %s81_s1 }
  0x4e   :  { %p1430_p7 = scmp.ne.s32.totalorder %s81_s1, %s1429_s24  ;;  %p1435_p9 = scmp.lt.s32.totalorder %s1429_s24, %s1429_s24 }
  0x50   :  { %p1436_p10 = por %p1435_p9, %p1434_p8 }
  0x52   :  { %p1437_p11 = pnand %p1436_p10, %p1430_p7 }
  0x54   :  { %1440 = shalt.err (!%p1437_p11)
}
  0x55   :  { %86 = dma.hbm_to_vmem [thread:$0]  %s1706_s7, 2048, %s81_s1, [#allocation9], %s1500_s5, %s1500_s5, %s1501_s13  }
  0x56   :  { %s1504_s28 = smov [#allocation11]   ;;  %s1441_s29 = scalar_lea.hbm %s1708_s9, 1024 }
  0x57   :  { %s94_s22 = sshll.u32 %s1504_s28, 4  ;;  %p1442_p12 = scmp.ne.s32.totalorder %s1708_s9, %s1441_s29  ;;  %s95_s22 = int_to_ptr.vmem [resolvable:$true] %s94_s22 }
  0x58   :  { %p1445_p13 = scmp.lt.u32.totalorder %s1441_s29, %s1708_s9 }
  0x5a   :  { %p1447_p0 = pnand %p1445_p13, %p1442_p12 }
  0x5c   :  { %1450 = shalt.err (!%p1447_p0)
}
  0x5d   :  { %s1451_s14 = scalar_lea.vmem %s95_s22, 1024  ;;  %p1456_p2 = scmp.lt.s32.totalorder %s95_s22, %s95_s22 }
  0x5e   :  { %p1452_p1 = scmp.ne.s32.totalorder %s95_s22, %s1451_s14  ;;  %p1457_p3 = scmp.lt.s32.totalorder %s1451_s14, %s1451_s14 }
  0x60   :  { %p1458_p4 = por %p1457_p3, %p1456_p2 }
  0x62   :  { %p1459_p5 = pnand %p1458_p4, %p1452_p1 }
  0x64   :  { %1462 = shalt.err (!%p1459_p5)
}
  0x65   :  { %100 = dma.hbm_to_vmem [thread:$0]  %s1708_s9, 1024, %s95_s22, [#allocation12], %s1500_s5, %s1500_s5, %s1501_s13  }
  0x66   :  { %1485 = dma.done.wait [#allocation3], 128  }
  0x67   :  { %1486 = vsyncadd [#allocation3], 4294967168 }
  0x68   :  { %1487 = dma.done.wait [#allocation6], 4352  }
  0x69   :  { %1488 = vsyncadd [#allocation6], 4294962944 }
  0x6a   :  { %1489 = dma.done.wait [#allocation9], 6144  }
  0x6b   :  { %1490 = vsyncadd [#allocation9], 4294961152 }
  0x6c   :  { %1491 = dma.done.wait [#allocation12], 1024  }
  0x6d   :  { %1492 = vsyncadd [#allocation12], 4294966272  ;;  %v1505_v0 = vmov 0   ;;  %vm155_vm0 = vcmask 1045504   ;;  %v1210_v3 = vld [vmem:[#allocation2] sm:$0xff]   ;;  %vm151_vm1 = vcmask 97280  }
  0x6e   :  { %194 = vmatprep.mubr.bf16.mxu0 %v1505_v0  ;;  %v1207_v1 = vld [vmem:[#allocation5 + $0x4] ss:$8 sps:$4 sm:$0x3f]   ;;  %v1209_v2 = vld [vmem:[#allocation5] ss:$8 sps:$4 sm:$0x3f]  }
  0x6f   :  { %1041 = vmatprep.subr.msk.bf16.mxu0 %vm155_vm0, %v1207_v1  ;;  %v157_v4 = vsel %vm155_vm0, %v1209_v2, 0  ;;  %v1211_v5 = vld [vmem:[#allocation7 + $0x4] ss:$8 sps:$4 sm:$0xff]   ;;  %v1213_v6 = vld [vmem:[#allocation7] ss:$8 sps:$4 sm:$0xff]   ;;  %v128_v1 = vlaneseq  ;;  %vm1507_vm2 = vmmov 0  }
  0x70   :  { %163 = vmatpush1.bf16.msra.mxu0 %v157_v4  ;;  %v1214_v7 = vld [vmem:[#allocation7 + $0x14] ss:$8 sps:$4 sm:$0xff]   ;;  %415 = vmatprep.subr.bf16.mxu1 %v1211_v5  ;;  %v1216_v8 = vld [vmem:[#allocation7 + $0x10] ss:$8 sps:$4 sm:$0xff]   ;;  %v1217_v9 = vld [vmem:[#allocation7 + $0x24] ss:$8 sps:$4 sm:$0xff]  }
  0x71   :  { %416 = vmatpush1.bf16.msra.mxu1 %v1213_v6  ;;  %v1219_v10 = vld [vmem:[#allocation7 + $0x20] ss:$8 sps:$4 sm:$0xff]   ;;  %v1220_v11 = vld [vmem:[#allocation7 + $0x34] ss:$8 sps:$4 sm:$0xff]   ;;  %v1222_v12 = vld [vmem:[#allocation7 + $0x30] ss:$8 sps:$4 sm:$0xff]  }
  0x72   :  { %417 = vmatprep.subr.bf16.mxu1 %v1214_v7  ;;  %v1223_v13 = vld [vmem:[#allocation7 + $0x44] ss:$8 sps:$4 sm:$0xff]   ;;  %v1225_v14 = vld [vmem:[#allocation7 + $0x40] ss:$8 sps:$4 sm:$0xff]   ;;  %v1226_v15 = vld [vmem:[#allocation7 + $0x54] ss:$8 sps:$4 sm:$0xff]  }
  0x73   :  { %1042 = vmatmul.mubr.msk.bf16.vlgmr.msra.gmra.mrb[0].mxu0 %vm151_vm1, %v1210_v3  ;;  %v1228_v16 = vld [vmem:[#allocation7 + $0x50] ss:$8 sps:$4 sm:$0xff]   ;;  %v1229_v17 = vld [vmem:[#allocation7 + $0x64] ss:$8 sps:$4 sm:$0xff]   ;;  %v1231_v18 = vld [vmem:[#allocation7 + $0x60] ss:$8 sps:$4 sm:$0xff]  }
  0x74   :  { %v1232_v19 = vld [vmem:[#allocation7 + $0x74] ss:$8 sps:$4 sm:$0xff]   ;;  %v1234_v20 = vld [vmem:[#allocation7 + $0x70] ss:$8 sps:$4 sm:$0xff]   ;;  %v1235_v21 = vld [vmem:[#allocation7 + $0x84] ss:$8 sps:$4 sm:$0xff]  }
  0x75   :  { %418 = vmatpush1.bf16.msra.mxu1 %v1216_v8  ;;  %v1237_v22 = vld [vmem:[#allocation7 + $0x80] ss:$8 sps:$4 sm:$0xff]   ;;  %v1238_v23 = vld [vmem:[#allocation7 + $0x94] ss:$8 sps:$4 sm:$0xff]   ;;  %v1240_v24 = vld [vmem:[#allocation7 + $0x90] ss:$8 sps:$4 sm:$0xff]  }
  0x76   :  { %419 = vmatprep.subr.bf16.mxu1 %v1217_v9  ;;  %v1241_v25 = vld [vmem:[#allocation7 + $0xa4] ss:$8 sps:$4 sm:$0xff]   ;;  %v1243_v26 = vld [vmem:[#allocation7 + $0xa0] ss:$8 sps:$4 sm:$0xff]   ;;  %v1244_v27 = vld [vmem:[#allocation7 + $0xb4] ss:$8 sps:$4 sm:$0xff]  }
  0x77   :  { %v1246_v28 = vld [vmem:[#allocation7 + $0xb0] ss:$8 sps:$4 sm:$0xff]   ;;  %v1247_v29 = vld [vmem:[#allocation7 + $0xc4] ss:$8 sps:$4 sm:$0xff]   ;;  %v1249_v30 = vld [vmem:[#allocation7 + $0xc0] ss:$8 sps:$4 sm:$0xff]  }
  0x78   :  { %v1250_v31 = vld [vmem:[#allocation7 + $0xd4] ss:$8 sps:$4 sm:$0xff]   ;;  %v1252_v32 = vld [vmem:[#allocation7 + $0xd0] ss:$8 sps:$4 sm:$0xff]   ;;  %v1253_v33 = vld [vmem:[#allocation7 + $0xe4] ss:$8 sps:$4 sm:$0xff]  }
  0x79   :  { %420 = vmatpush1.bf16.msra.mxu1 %v1219_v10  ;;  %v1255_v34 = vld [vmem:[#allocation7 + $0xe0] ss:$8 sps:$4 sm:$0xff]   ;;  %v1256_v35 = vld [vmem:[#allocation7 + $0xf4] ss:$8 sps:$4 sm:$0xff]   ;;  %v1258_v36 = vld [vmem:[#allocation7 + $0xf0] ss:$8 sps:$4 sm:$0xff]  }
  0x7a   :  { %421 = vmatprep.subr.bf16.mxu1 %v1220_v11  ;;  %v1259_v37 = vld [vmem:[#allocation8] ss:$8 sps:$4 sm:$0xff]   ;;  %v1261_v38 = vld [vmem:[#allocation8 + $0x4] ss:$8 sps:$4 sm:$0xff]   ;;  %v1264_v39 = vld [vmem:[#allocation8 + $0x14] ss:$8 sps:$4 sm:$0xff]  }
  0x7b   :  { %668 = vmatprep.subr.bf16.mxu0 %v1261_v38  ;;  %v1262_v40 = vld [vmem:[#allocation8 + $0x10] ss:$8 sps:$4 sm:$0xff]   ;;  %v1267_v41 = vld [vmem:[#allocation8 + $0x24] ss:$8 sps:$4 sm:$0xff]   ;;  %v1265_v42 = vld [vmem:[#allocation8 + $0x20] ss:$8 sps:$4 sm:$0xff]  }
  0x7c   :  { %669 = vmatpush1.bf16.msra.mxu0 %v1259_v37  ;;  %v1270_v43 = vld [vmem:[#allocation8 + $0x34] ss:$8 sps:$4 sm:$0xff]   ;;  %v1268_v44 = vld [vmem:[#allocation8 + $0x30] ss:$8 sps:$4 sm:$0xff]   ;;  %v1273_v45 = vld [vmem:[#allocation8 + $0x44] ss:$8 sps:$4 sm:$0xff]  }
  0x7d   :  { %422 = vmatpush1.bf16.msra.mxu1 %v1222_v12  ;;  %670 = vmatprep.subr.bf16.mxu0 %v1264_v39  ;;  %v1271_v46 = vld [vmem:[#allocation8 + $0x40] ss:$8 sps:$4 sm:$0xff]   ;;  %v1276_v47 = vld [vmem:[#allocation8 + $0x54] ss:$8 sps:$4 sm:$0xff]   ;;  %v1274_v48 = vld [vmem:[#allocation8 + $0x50] ss:$8 sps:$4 sm:$0xff]  }
  0x7e   :  { %423 = vmatprep.subr.bf16.mxu1 %v1223_v13  ;;  %v1279_v49 = vld [vmem:[#allocation8 + $0x64] ss:$8 sps:$4 sm:$0xff]   ;;  %v1277_v50 = vld [vmem:[#allocation8 + $0x60] ss:$8 sps:$4 sm:$0xff]   ;;  %v1282_v51 = vld [vmem:[#allocation8 + $0x74] ss:$8 sps:$4 sm:$0xff]  }
  0x7f   :  { %v1280_v52 = vld [vmem:[#allocation8 + $0x70] ss:$8 sps:$4 sm:$0xff]   ;;  %v1285_v53 = vld [vmem:[#allocation8 + $0x84] ss:$8 sps:$4 sm:$0xff]   ;;  %v1283_v54 = vld [vmem:[#allocation8 + $0x80] ss:$8 sps:$4 sm:$0xff]  }
  0x80   :  { %671 = vmatpush1.bf16.msra.mxu0 %v1262_v40  ;;  %v1288_v55 = vld [vmem:[#allocation8 + $0x94] ss:$8 sps:$4 sm:$0xff]   ;;  %v1286_v56 = vld [vmem:[#allocation8 + $0x90] ss:$8 sps:$4 sm:$0xff]   ;;  %v1291_v57 = vld [vmem:[#allocation8 + $0xa4] ss:$8 sps:$4 sm:$0xff]  }
  0x81   :  { %424 = vmatpush1.bf16.msra.mxu1 %v1225_v14  ;;  %672 = vmatprep.subr.bf16.mxu0 %v1267_v41  ;;  %v1289_v58 = vld [vmem:[#allocation8 + $0xa0] ss:$8 sps:$4 sm:$0xff]   ;;  %v1294_v59 = vld [vmem:[#allocation8 + $0xb4] ss:$8 sps:$4 sm:$0xff]   ;;  %v1292_v60 = vld [vmem:[#allocation8 + $0xb0] ss:$8 sps:$4 sm:$0xff]  }
  0x82   :  { %425 = vmatprep.subr.bf16.mxu1 %v1226_v15  ;;  %v1297_v61 = vld [vmem:[#allocation8 + $0xc4] ss:$8 sps:$4 sm:$0xff]   ;;  %v1295_v62 = vld [vmem:[#allocation8 + $0xc0] ss:$8 sps:$4 sm:$0xff]   ;;  %v1300_v63 = vld [vmem:[#allocation8 + $0xd4] ss:$8 sps:$4 sm:$0xff]  }
  0x83   :  { %v1298_v0 = vld [vmem:[#allocation8 + $0xd0] ss:$8 sps:$4 sm:$0xff]   ;;  %v129_v2 = vshrl.u32 %v128_v1, 7  ;;  %v126_v4 = vld [vmem:[%s1701_s2] sm:$0x3]  ;;  %s1508_s18 = smov [#allocation13]  }
  0x84   :  { %673 = vmatpush1.bf16.msra.mxu0 %v1265_v42  ;;  %v243_v37 = vld [vmem:[%s1703_s4] sm:$0x3] }
  0x85   :  { %426 = vmatpush1.bf16.msra.mxu1 %v1228_v16  ;;  %674 = vmatprep.subr.bf16.mxu0 %v1270_v43  ;;  %v1659_v3 = vsub.s32 0, %v129_v2  ;;  %v1664_v5 = vsub.s32 1, %v129_v2  ;;  %v496_v1 = vld [vmem:[%s1705_s6] sm:$0x3] }
  0x86   :  { %427 = vmatprep.subr.bf16.mxu1 %v1229_v17 }
  0x87   :  { %v131_v6 = vrot.slane %v126_v4, %v1659_v3  ;;  %v135_v7 = vrot.slane %v126_v4, %v1664_v5  ;;  %v248_v38 = vrot.slane %v243_v37, %v1659_v3  ;;  %v252_v39 = vrot.slane %v243_v37, %v1664_v5 }
  0x88   :  { %675 = vmatpush1.bf16.msra.mxu0 %v1268_v44  ;;  %v501_v2 = vrot.slane %v496_v1, %v1659_v3  ;;  %v505_v4 = vrot.slane %v496_v1, %v1664_v5  ;;  %v1329_v3 = vld [vmem:[#allocation11 + $0x30] sm:$0xff]   ;;  %v1330_v5 = vld [vmem:[#allocation11 + $0x38] sm:$0xff]  }
  0x89   :  { %428 = vmatpush1.bf16.msra.mxu1 %v1231_v18  ;;  %676 = vmatprep.subr.bf16.mxu0 %v1273_v45 }
  0x8a   :  { %429 = vmatprep.subr.bf16.mxu1 %v1232_v19 }
  0x8c   :  { %677 = vmatpush1.bf16.msra.mxu0 %v1271_v46 }
  0x8d   :  { %430 = vmatpush1.bf16.msra.mxu1 %v1234_v20  ;;  %678 = vmatprep.subr.bf16.mxu0 %v1276_v47 }
  0x8e   :  { %431 = vmatprep.subr.bf16.mxu1 %v1235_v21 }
  0x90   :  { %679 = vmatpush1.bf16.msra.mxu0 %v1274_v48 }
  0x91   :  { %432 = vmatpush1.bf16.msra.mxu1 %v1237_v22  ;;  %680 = vmatprep.subr.bf16.mxu0 %v1279_v49  ;;  %v1303_v22 = vld [vmem:[#allocation8 + $0xe4] ss:$8 sps:$4 sm:$0xff]  }
  0x92   :  { %433 = vmatprep.subr.bf16.mxu1 %v1238_v23  ;;  %v1301_v23 = vld [vmem:[#allocation8 + $0xe0] ss:$8 sps:$4 sm:$0xff]  }
  0x94   :  { %681 = vmatpush1.bf16.msra.mxu0 %v1277_v50 }
  0x95   :  { %434 = vmatpush1.bf16.msra.mxu1 %v1240_v24  ;;  %682 = vmatprep.subr.bf16.mxu0 %v1282_v51  ;;  %v1306_v24 = vld [vmem:[#allocation8 + $0xf4] ss:$8 sps:$4 sm:$0xff]  }
  0x96   :  { %435 = vmatprep.subr.bf16.mxu1 %v1241_v25  ;;  %v1304_v25 = vld [vmem:[#allocation8 + $0xf0] ss:$8 sps:$4 sm:$0xff]  }
  0x98   :  { %683 = vmatpush1.bf16.msra.mxu0 %v1280_v52 }
  0x99   :  { %436 = vmatpush1.bf16.msra.mxu1 %v1243_v26  ;;  %684 = vmatprep.subr.bf16.mxu0 %v1285_v53  ;;  %v1307_v26 = vld [vmem:[#allocation10 + $0x40] sm:$0xff]  }
  0x9a   :  { %437 = vmatprep.subr.bf16.mxu1 %v1244_v27  ;;  %v1308_v27 = vld [vmem:[#allocation10] sm:$0xff]  }
  0x9c   :  { %685 = vmatpush1.bf16.msra.mxu0 %v1283_v54  ;;  %v1318_v54 = vld [vmem:[#allocation10 + $0x28] sm:$0xff]  }
  0x9d   :  { %438 = vmatpush1.bf16.msra.mxu1 %v1246_v28  ;;  %686 = vmatprep.subr.bf16.mxu0 %v1288_v55  ;;  %v1309_v28 = vld [vmem:[#allocation10 + $0x48] sm:$0xff]   ;;  %v1319_v55 = vld [vmem:[#allocation10 + $0x70] sm:$0xff]  }
  0x9e   :  { %439 = vmatprep.subr.bf16.mxu1 %v1247_v29  ;;  %v1310_v29 = vld [vmem:[#allocation10 + $0x8] sm:$0xff]  }
  0xa0   :  { %687 = vmatpush1.bf16.msra.mxu0 %v1286_v56  ;;  %v1320_v56 = vld [vmem:[#allocation10 + $0x30] sm:$0xff]  }
  0xa1   :  { %440 = vmatpush1.bf16.msra.mxu1 %v1249_v30  ;;  %688 = vmatprep.subr.bf16.mxu0 %v1291_v57  ;;  %v1311_v30 = vld [vmem:[#allocation10 + $0x50] sm:$0xff]   ;;  %v1321_v57 = vld [vmem:[#allocation10 + $0x78] sm:$0xff]  }
  0xa2   :  { %441 = vmatprep.subr.bf16.mxu1 %v1250_v31  ;;  %v1312_v31 = vld [vmem:[#allocation10 + $0x10] sm:$0xff]  }
  0xa4   :  { %689 = vmatpush1.bf16.msra.mxu0 %v1289_v58  ;;  %v1322_v58 = vld [vmem:[#allocation10 + $0x38] sm:$0xff]  }
  0xa5   :  { %442 = vmatpush1.bf16.msra.mxu1 %v1252_v32  ;;  %690 = vmatprep.subr.bf16.mxu0 %v1294_v59  ;;  %v1313_v32 = vld [vmem:[#allocation10 + $0x58] sm:$0xff]   ;;  %v1323_v59 = vld [vmem:[#allocation11] sm:$0xff]  }
  0xa6   :  { %443 = vmatprep.subr.bf16.mxu1 %v1253_v33  ;;  %v1314_v33 = vld [vmem:[#allocation10 + $0x18] sm:$0xff]  }
  0xa8   :  { %691 = vmatpush1.bf16.msra.mxu0 %v1292_v60  ;;  %v1506_v60 = vmov 0.0  }
  0xa9   :  { %444 = vmatpush1.bf16.msra.mxu1 %v1255_v34  ;;  %692 = vmatprep.subr.bf16.mxu0 %v1297_v61  ;;  %v1315_v34 = vld [vmem:[#allocation10 + $0x60] sm:$0xff]   ;;  %v1324_v61 = vld [vmem:[#allocation11 + $0x8] sm:$0xff]  }
  0xaa   :  { %445 = vmatprep.subr.bf16.mxu1 %v1256_v35  ;;  %v1316_v35 = vld [vmem:[#allocation10 + $0x20] sm:$0xff]  }
  0xac   :  { %693 = vmatpush1.bf16.msra.mxu0 %v1295_v62  ;;  %v1325_v62 = vld [vmem:[#allocation11 + $0x10] sm:$0xff]  }
  0xad   :  { %446 = vmatpush1.bf16.msra.mxu1 %v1258_v36  ;;  %694 = vmatprep.subr.bf16.mxu0 %v1300_v63  ;;  %v1317_v36 = vld [vmem:[#allocation10 + $0x68] sm:$0xff]   ;;  %v1326_v63 = vld [vmem:[#allocation11 + $0x18] sm:$0xff]  }
  0xae   :  { %1142 = vmatprep.subr.bf16.mxu1 %v1307_v26 }
  0xb0   :  { %695 = vmatpush1.bf16.msra.mxu0 %v1298_v0  ;;  %v1327_v0 = vld [vmem:[#allocation11 + $0x20] sm:$0xff]  }
  0xb1   :  { %696 = vmatprep.subr.bf16.mxu0 %v1303_v22  ;;  %v1107_v22 = vld [vmem:[%s1707_s8] ss:$0 sm:$0xff]  ;;  %s1023_s8 = sshll.u32 %s1508_s18, 4  ;;  %s1024_s8 = int_to_ptr.vmem [resolvable:$true] %s1023_s8 }
  0xb2   :  { %s1463_s24 = scalar_lea.vmem %s1024_s8, 128  ;;  %p1468_p7 = scmp.lt.s32.totalorder %s1024_s8, %s1024_s8 }
  0xb3   :  { %p1464_p6 = scmp.ne.s32.totalorder %s1024_s8, %s1463_s24  ;;  %p1469_p8 = scmp.lt.s32.totalorder %s1463_s24, %s1463_s24 }
  0xb4   :  { %697 = vmatpush1.bf16.msra.mxu0 %v1301_v23 }
  0xb5   :  { %698 = vmatprep.subr.bf16.mxu0 %v1306_v24  ;;  %p1470_p9 = por %p1469_p8, %p1468_p7 }
  0xb7   :  { %p1471_p10 = pnand %p1470_p9, %p1464_p6 }
  0xb8   :  { %699 = vmatpush1.bf16.msra.mxu0 %v1304_v25 }
  0xb9   :  { %1173 = vmatprep.subr.bf16.mxu0 %v1506_v60 }
 0x146   :  { %v196_v8 = vpop.f32.mrb[0].mxu0 }
 0x147   :  { %v197_v9 = vadd.f32 %v196_v8, %v131_v6  ;;  %v198_v10 = vpop.f32.mrb[1].mxu0 }
 0x148   :  { %v199_v11 = vadd.f32 %v198_v10, %v135_v7  ;;  %v200_v12 = vpop.f32.mrb[2].mxu0 }
 0x149   :  { %v201_v13 = vadd.f32 %v200_v12, %v131_v6  ;;  %v202_v14 = vpop.f32.mrb[3].mxu0  ;;  %v205_v16 = vmax.f32 %v197_v9, 0.0 }
 0x14a   :  { %v203_v15 = vadd.f32 %v202_v14, %v135_v7  ;;  %v206_v18 = vmax.f32 %v199_v11, 0.0 }
 0x14b   :  { %v207_v17 = vmax.f32 %v201_v13, 0.0 }
 0x14c   :  { %v208_v19 = vmax.f32 %v203_v15, 0.0 }
 0x14d   :  { %v209_v20 = vpack.c.bf16 %v207_v17, %v205_v16 }
 0x14e   :  { %v210_v21 = vpack.c.bf16 %v208_v19, %v206_v18 }
 0x150   :  { %447 = vmatprep.mubr.bf16.mxu1 %v210_v21 }
 0x151   :  { %448 = vmatmul.mubr.bf16.vlgmr.msra.gmra.mrb[0].mxu1 %v209_v20  ;;  %v1328_v20 = vld [vmem:[#allocation11 + $0x28] sm:$0xff]  }
 0x152   :  { %1143 = vmatpush3.bf16.msra.mxu1 %v1308_v27 }
 0x153   :  { %1144 = vmatprep.subr.bf16.mxu1 %v1309_v28 }
 0x156   :  { %1145 = vmatpush3.bf16.msra.mxu1 %v1310_v29 }
 0x157   :  { %1146 = vmatprep.subr.bf16.mxu1 %v1311_v30 }
 0x15a   :  { %1147 = vmatpush3.bf16.msra.mxu1 %v1312_v31 }
 0x15b   :  { %1148 = vmatprep.subr.bf16.mxu1 %v1313_v32 }
 0x15e   :  { %1149 = vmatpush3.bf16.msra.mxu1 %v1314_v33  ;;  %v1124_v33 = vld [vmem:[%s1709_s10] ss:$0 sm:$0xff] }
 0x15f   :  { %1150 = vmatprep.subr.bf16.mxu1 %v1315_v34 }
 0x162   :  { %1151 = vmatpush3.bf16.msra.mxu1 %v1316_v35 }
 0x163   :  { %1152 = vmatprep.subr.bf16.mxu1 %v1317_v36 }
 0x166   :  { %1153 = vmatpush3.bf16.msra.mxu1 %v1318_v54 }
 0x167   :  { %1154 = vmatprep.subr.bf16.mxu1 %v1319_v55 }
 0x16a   :  { %1155 = vmatpush3.bf16.msra.mxu1 %v1320_v56 }
 0x16b   :  { %1156 = vmatprep.subr.bf16.mxu1 %v1321_v57 }
 0x16e   :  { %1157 = vmatpush3.bf16.msra.mxu1 %v1322_v58 }
 0x224   :  { %v449_v40 = vpop.f32.mrb[0].mxu1 }
 0x225   :  { %v450_v41 = vadd.f32 %v449_v40, %v248_v38  ;;  %v451_v42 = vpop.f32.mrb[1].mxu1 }
 0x226   :  { %v452_v43 = vadd.f32 %v451_v42, %v252_v39  ;;  %v453_v44 = vpop.f32.mrb[2].mxu1 }
 0x227   :  { %v454_v45 = vadd.f32 %v453_v44, %v248_v38  ;;  %v455_v46 = vpop.f32.mrb[3].mxu1  ;;  %v458_v48 = vmax.f32 %v450_v41, 0.0 }
 0x228   :  { %v456_v47 = vadd.f32 %v455_v46, %v252_v39  ;;  %v459_v50 = vmax.f32 %v452_v43, 0.0 }
 0x229   :  { %v460_v49 = vmax.f32 %v454_v45, 0.0 }
 0x22a   :  { %v461_v51 = vmax.f32 %v456_v47, 0.0 }
 0x22b   :  { %v462_v52 = vpack.c.bf16 %v460_v49, %v458_v48 }
 0x22c   :  { %v463_v53 = vpack.c.bf16 %v461_v51, %v459_v50 }
 0x22e   :  { %700 = vmatprep.mubr.bf16.mxu0 %v463_v53 }
 0x22f   :  { %701 = vmatmul.mubr.bf16.vlgmr.msra.gmra.mrb[4].mxu0 %v462_v52 }
 0x230   :  { %1174 = vmatpush3.bf16.msra.mxu0 %v1323_v59  ;;  %1189 = vmatprep.mubr.msk.bf16.mxu0 %vm1507_vm2, %v1506_v60 }
 0x231   :  { %1175 = vmatprep.subr.bf16.mxu0 %v1506_v60 }
 0x234   :  { %1176 = vmatpush3.bf16.msra.mxu0 %v1324_v61 }
 0x235   :  { %1177 = vmatprep.subr.bf16.mxu0 %v1506_v60 }
 0x238   :  { %1178 = vmatpush3.bf16.msra.mxu0 %v1325_v62 }
 0x239   :  { %1179 = vmatprep.subr.bf16.mxu0 %v1506_v60 }
 0x23c   :  { %1180 = vmatpush3.bf16.msra.mxu0 %v1326_v63 }
 0x23d   :  { %1181 = vmatprep.subr.bf16.mxu0 %v1506_v60 }
 0x240   :  { %1182 = vmatpush3.bf16.msra.mxu0 %v1327_v0 }
 0x241   :  { %1183 = vmatprep.subr.bf16.mxu0 %v1506_v60 }
 0x244   :  { %1184 = vmatpush3.bf16.msra.mxu0 %v1328_v20 }
 0x245   :  { %1185 = vmatprep.subr.bf16.mxu0 %v1506_v60 }
 0x248   :  { %1186 = vmatpush3.bf16.msra.mxu0 %v1329_v3 }
 0x249   :  { %1187 = vmatprep.subr.bf16.mxu0 %v1506_v60 }
 0x24c   :  { %1188 = vmatpush3.bf16.msra.mxu0 %v1330_v5 }
 0x302   :  { %v702_v6 = vpop.f32.mrb[4].mxu0 }
 0x303   :  { %v703_v7 = vadd.f32 %v702_v6, %v501_v2  ;;  %v704_v8 = vpop.f32.mrb[5].mxu0 }
 0x304   :  { %v705_v9 = vadd.f32 %v704_v8, %v505_v4  ;;  %v706_v10 = vpop.f32.mrb[6].mxu0 }
 0x305   :  { %v707_v11 = vadd.f32 %v706_v10, %v501_v2  ;;  %v708_v12 = vpop.f32.mrb[7].mxu0  ;;  %v711_v14 = vmax.f32 %v703_v7, 0.0 }
 0x306   :  { %v709_v13 = vadd.f32 %v708_v12, %v505_v4  ;;  %v712_v16 = vmax.f32 %v705_v9, 0.0 }
 0x307   :  { %v713_v15 = vmax.f32 %v707_v11, 0.0 }
 0x308   :  { %v714_v17 = vmax.f32 %v709_v13, 0.0 }
 0x309   :  { %v715_v18 = vpack.c.bf16 %v713_v15, %v711_v14 }
 0x30a   :  { %v716_v19 = vpack.c.bf16 %v714_v17, %v712_v16 }
 0x30c   :  { %884 = vmatprep.mubr.bf16.mxu1 %v716_v19 }
 0x30d   :  { %885 = vmatmul.mubr.bf16.vlgmr.msra.gmra.mrb[4].mxu1 %v715_v18 }
 0x3e0   :  { %v1158_v21 = vpop.f32.mrb[4].mxu1 }
 0x3e1   :  { %v1159_v23 = vpop.f32.mrb[5].mxu1 }
 0x3e2   :  { %v1160_v24 = vadd.f32 %v1159_v23, %v1158_v21  ;;  %v1161_v25 = vpop.f32.mrb[6].mxu1 }
 0x3e3   :  { %v1162_v26 = vpop.f32.mrb[7].mxu1 }
 0x3e4   :  { %v887_v27 = vadd.f32 %v1160_v24, %v1107_v22  ;;  %v1163_v28 = vadd.f32 %v1162_v26, %v1161_v25 }
 0x3e6   :  { %v890_v29 = vadd.f32 %v1163_v28, %v1107_v22  ;;  %v893_v30 = vmax.f32 %v887_v27, 0.0 }
 0x3e8   :  { %v894_v31 = vmax.f32 %v890_v29, 0.0 }
 0x3ea   :  { %v895_v32 = vpack.c.bf16 %v894_v31, %v893_v30 }
 0x3ec   :  { %1190 = vmatmul.mubr.bf16.vlgmr.msra.gmra.mrb[8].mxu0 %v895_v32 }
 0x4bf   :  { %v1001_v34 = vpop.f32.mrb[8].mxu0 }
 0x4c0   :  { %v1191_v35 = vpop.f32.mrb[9].mxu0  ;;  %v1002_v37 = vadd.f32 %v1124_v33, %v1001_v34 }
 0x4c1   :  { %v1004_v36 = vpop.f32.mrb[10].mxu0 }
 0x4c2   :  { %v1005_v38 = vadd.f32 %v1124_v33, %v1004_v36  ;;  %v1192_v39 = vpop.f32.mrb[11].mxu0 }
 0x4c4   :  { %v1140_v40 = vpack.c.bf16 %v1005_v38, %v1002_v37 }
 0x4c6   :  { %1141 = vst [vmem:[#allocation13] sm:$0xff] %v1140_v40  }
 0x4c7   :  { %1474 = shalt.err (!%p1471_p10)
}
 0x4c8   :  { %s1475_s27 = scalar_lea.hbm %s1710_s11, 128 }
 0x4c9   :  { %p1476_p11 = scmp.ne.s32.totalorder %s1710_s11, %s1475_s27  ;;  %p1479_p12 = scmp.lt.u32.totalorder %s1475_s27, %s1710_s11 }
 0x4cb   :  { %p1481_p13 = pnand %p1479_p12, %p1476_p11 }
 0x4cd   :  { %1484 = shalt.err (!%p1481_p13)
}
 0x4ce   :  { %1029 = dma.vmem_to_hbm [thread:$0]  %s1024_s8, 128, %s1710_s11, [#allocation4], %s1500_s5, %s1500_s5, %s1501_s13  }
 0x4cf   :  { %1493 = dma.done.wait [#allocation4], 128  }
 0x4d0   :  { %1494 = vsyncadd [#allocation4], 4294967168 }
 0x4d1   :  { %1033 = vsyncpa [#allocation3], 1 }
 0x4d2   :  { %1034 = vsyncpa [#allocation6], 1 }
 0x4d3   :  { %1035 = vsyncpa [#allocation9], 1 }
 0x4d4   :  { %1036 = vsyncpa [#allocation12], 1 }
 0x4d5   :  { %1037 = vsyncpa [#allocation4], 1 }

</bundles_post_ra>
